<compile_context>
chip_gen: v6e
topology: v6e:2x2x1
jax: 0.10.0
libtpu: 0.0.40
codegen_flags: <defaults>
</compile_context>

<pallas_src>
import jax
import jax.numpy as jnp
from jax.experimental import pallas as pl
from jax.experimental.pallas import tpu as pltpu

F32 = jnp.float32

_HIDDEN = 32
# Safe scoped-VMEM target: below v5e/v6e defaults-after-raise and well under
# v7x's 64 MiB physical VMEM (blocks are double-buffered by the pipeline).
_VMEM_BUDGET = 28 * 1024 * 1024


def _round_up(x, m):
    return ((x + m - 1) // m) * m


def _num_tensorcores():
    """2 TensorCores per chip on v7x; 1 on v5e/v6e (conservative fallback 1)."""
    try:
        kind = jax.devices()[0].device_kind.lower()
    except Exception:
        return 1
    return 2 if ("v7" in kind or "7x" in kind) else 1


def _derive_tm_cap(K, n_out, budget=_VMEM_BUDGET):
    """Largest row-tile that keeps the double-buffered working set in budget."""
    # Resident weights/biases (count them double-buffered, conservatively).
    w_bytes = 2 * 4 * (K * _HIDDEN + _HIDDEN + _HIDDEN * _HIDDEN + _HIDDEN
                       + _HIDDEN * n_out + n_out)
    # Per-row bytes: x block + out block (both 2x buffered) plus ~3 HIDDEN-wide
    # f32 intermediates that may live in VMEM / vreg spill.
    per_row = 4 * (2 * K + 2 * n_out + 3 * _HIDDEN)
    avail = max(budget - w_bytes, 1 << 20)
    cap = (avail // per_row) // 8 * 8
    # Beyond ~16K rows the per-step overhead is already fully amortized.
    return int(max(8, min(cap, 16384)))


def _choose_tiling(M, tm_cap, n_cores):
    """Pick (tile_rows, num_blocks) given batch size and core count."""
    m8 = _round_up(max(M, 1), 8)
    if n_cores >= 2 and m8 >= 16:
        # v7x: split across both TensorCores; keep nblk a multiple of 2.
        if m8 <= 2 * tm_cap:
            return _round_up(pl.cdiv(m8, 2), 8), 2
        tm = tm_cap
        nblk = pl.cdiv(m8, tm)
        if nblk % 2:
            nblk += 1
        return tm, nblk
    # Single-TC (v5e/v6e): one block unless M exceeds the VMEM-derived cap.
    if m8 <= tm_cap:
        return m8, 1
    return tm_cap, pl.cdiv(m8, tm_cap)


# ----------------------------- fused MLP32 kernel ----------------------------
def _mlp32_kernel(x_ref, w1_ref, b1_ref, w2_ref, b2_ref, w3_ref, b3_ref, o_ref):
    # Layer 1: Linear + ReLU
    h = jnp.dot(x_ref[...], w1_ref[...], preferred_element_type=jnp.float32)
    h = jnp.maximum(h + b1_ref[...], 0.0)
    # Layer 2: Linear + ReLU
    h = jnp.dot(h, w2_ref[...], preferred_element_type=jnp.float32)
    h = jnp.maximum(h + b2_ref[...], 0.0)
    # Layer 3: Linear + Sigmoid (narrow output, no lane padding)
    h = jnp.dot(h, w3_ref[...], preferred_element_type=jnp.float32)
    o_ref[...] = jax.nn.sigmoid(h + b3_ref[...])


def mlp32_forward(x, params):
    """x: (M, input_dim) f32 -> (M, output_dim) f32, entire MLP in one kernel."""
    w1, b1, w2, b2, w3, b3 = params
    M, K = x.shape
    h1 = w1.shape[1]
    h2 = w2.shape[1]
    n_out = w3.shape[1]

    n_cores = _num_tensorcores()
    tm_cap = _derive_tm_cap(K, n_out)
    tm, nblk = _choose_tiling(M, tm_cap, n_cores)

    m_pad = tm * nblk
    if m_pad != M:
        x = jnp.pad(x, ((0, m_pad - M), (0, 0)))

    # Explicit scoped-VMEM limit from the working-set estimate (with slack).
    est = (2 * 4 * (K * h1 + h1 + h1 * h2 + h2 + h2 * n_out + n_out)
           + 4 * tm * (2 * K + 2 * n_out + 3 * h2) + (2 << 20))
    vmem_limit = int(min(max(est, 16 << 20), 48 << 20))

    def const_spec(shape):
        # Weight/bias blocks: constant index_map -> stay resident in VMEM.
        return pl.BlockSpec(shape, lambda i: (0, 0))

    out = pl.pallas_call(
        _mlp32_kernel,
        out_shape=jax.ShapeDtypeStruct((m_pad, n_out), F32),
        grid=(nblk,),
        in_specs=[
            pl.BlockSpec((tm, K), lambda i: (i, 0)),    # x rows, tiled over M
            const_spec((K, h1)), const_spec((1, h1)),   # layer 1
            const_spec((h1, h2)), const_spec((1, h2)),  # layer 2
            const_spec((h2, n_out)), const_spec((1, n_out)),  # layer 3
        ],
        out_specs=pl.BlockSpec((tm, n_out), lambda i: (i, 0)),
        compiler_params=pltpu.CompilerParams(
            dimension_semantics=("parallel",),
            vmem_limit_bytes=vmem_limit),
    )(x, w1, b1, w2, b2, w3, b3)

    return out[:M, :]


# ------------------------------ reference & init -----------------------------
def mlp32_reference(x, params):
    w1, b1, w2, b2, w3, b3 = params
    h = jnp.maximum(x @ w1 + b1, 0.0)
    h = jnp.maximum(h @ w2 + b2, 0.0)
    return jax.nn.sigmoid(h @ w3 + b3)


def init_params(key, input_dim, output_dim):
    """nn.Linear-style uniform(-1/sqrt(fan_in), 1/sqrt(fan_in)) init.

    Weights are (in_features, out_features) -- transpose PyTorch weights
    ((out, in)) when loading real checkpoints.
    """
    dims = [(input_dim, _HIDDEN), (_HIDDEN, _HIDDEN), (_HIDDEN, output_dim)]
    keys = jax.random.split(key, 2 * len(dims))
    params = []
    for li, (din, dout) in enumerate(dims):
        bound = 1.0 / float(din) ** 0.5
        w = jax.random.uniform(keys[2 * li], (din, dout), F32, -bound, bound)
        b = jax.random.uniform(keys[2 * li + 1], (1, dout), F32, -bound, bound)
        params += [w, b]
    return tuple(params)


# ----------------------------------- main ------------------------------------
if __name__ == "__main__":
    key = jax.random.PRNGKey(0)
    pkey, xkey = jax.random.split(key)

    input_dim, output_dim = 64, 1
    batch = 16

    params = init_params(pkey, input_dim, output_dim)
    x = jax.random.normal(xkey, (batch, input_dim), dtype=F32)

    fwd = jax.jit(mlp32_forward)
    out = jax.block_until_ready(fwd(x, params))

    assert out.shape == (batch, output_dim), out.shape
    assert bool(jnp.all(jnp.isfinite(out)))
    ref = mlp32_reference(x, params)
    max_err = float(jnp.max(jnp.abs(out - ref)))
    assert max_err < 1e-5, max_err
    print("KERNEL_OK")
</pallas_src>

<mosaic_0001>
module attributes {stable_mosaic.version = 11 : i64} {
  func.func @_mlp32_kernel(%arg0: i32, %arg1: memref<16x64xf32, #tpu.memory_space<vmem>>, %arg2: memref<64x32xf32, #tpu.memory_space<vmem>>, %arg3: memref<1x32xf32, #tpu.memory_space<vmem>>, %arg4: memref<32x32xf32, #tpu.memory_space<vmem>>, %arg5: memref<1x32xf32, #tpu.memory_space<vmem>>, %arg6: memref<32x1xf32, #tpu.memory_space<vmem>>, %arg7: memref<1x1xf32, #tpu.memory_space<vmem>>, %arg8: memref<16x1xf32, #tpu.memory_space<vmem>>) attributes {dimension_semantics = [#tpu.dimension_semantics<parallel>], iteration_bounds = array<i64: 1>, scalar_prefetch = 0 : i64, scratch_operands = 0 : i64, tpu.core_type = #tpu.core_type<tc>, window_params = [{transform_indices = @transform_0, window_bounds = array<i64: 16, 64>}, {pipeline_mode = #tpu.pipeline_mode<synchronous>, transform_indices = @transform_1, window_bounds = array<i64: 64, 32>}, {pipeline_mode = #tpu.pipeline_mode<synchronous>, transform_indices = @transform_2, window_bounds = array<i64: 1, 32>}, {pipeline_mode = #tpu.pipeline_mode<synchronous>, transform_indices = @transform_3, window_bounds = array<i64: 32, 32>}, {pipeline_mode = #tpu.pipeline_mode<synchronous>, transform_indices = @transform_4, window_bounds = array<i64: 1, 32>}, {pipeline_mode = #tpu.pipeline_mode<synchronous>, transform_indices = @transform_5, window_bounds = array<i64: 32, 1>}, {pipeline_mode = #tpu.pipeline_mode<synchronous>, transform_indices = @transform_6, window_bounds = array<i64: 1, 1>}, {transform_indices = @transform_7, window_bounds = array<i64: 16, 1>}]} {
    %c0 = arith.constant 0 : index
    %c0_0 = arith.constant 0 : index
    %0 = vector.load %arg1[%c0, %c0_0] : memref<16x64xf32, #tpu.memory_space<vmem>>, vector<16x64xf32>
    %c0_1 = arith.constant 0 : index
    %c0_2 = arith.constant 0 : index
    %1 = vector.load %arg2[%c0_1, %c0_2] : memref<64x32xf32, #tpu.memory_space<vmem>>, vector<64x32xf32>
    %cst = arith.constant dense<0.000000e+00> : vector<16x32xf32>
    %2 = tpu.matmul %0, %1, %cst {dimension_numbers = #tpu.dot_dimension_numbers<[1], [0], [0], [1], [0, 0, 1, 1], [], []>} : vector<16x64xf32>, vector<64x32xf32>, vector<16x32xf32> -> vector<16x32xf32>
    %c0_3 = arith.constant 0 : index
    %c0_4 = arith.constant 0 : index
    %3 = vector.load %arg3[%c0_3, %c0_4] : memref<1x32xf32, #tpu.memory_space<vmem>>, vector<1x32xf32>
    %4 = vector.broadcast %3 : vector<1x32xf32> to vector<16x32xf32>
    %5 = arith.addf %2, %4 : vector<16x32xf32>
    %cst_5 = arith.constant 0.000000e+00 : f32
    %6 = vector.broadcast %cst_5 : f32 to vector<16x32xf32>
    %7 = arith.maximumf %5, %6 : vector<16x32xf32>
    %c0_6 = arith.constant 0 : index
    %c0_7 = arith.constant 0 : index
    %8 = vector.load %arg4[%c0_6, %c0_7] : memref<32x32xf32, #tpu.memory_space<vmem>>, vector<32x32xf32>
    %cst_8 = arith.constant dense<0.000000e+00> : vector<16x32xf32>
    %9 = tpu.matmul %7, %8, %cst_8 {dimension_numbers = #tpu.dot_dimension_numbers<[1], [0], [0], [1], [0, 0, 1, 1], [], []>} : vector<16x32xf32>, vector<32x32xf32>, vector<16x32xf32> -> vector<16x32xf32>
    %c0_9 = arith.constant 0 : index
    %c0_10 = arith.constant 0 : index
    %10 = vector.load %arg5[%c0_9, %c0_10] : memref<1x32xf32, #tpu.memory_space<vmem>>, vector<1x32xf32>
    %11 = vector.broadcast %10 : vector<1x32xf32> to vector<16x32xf32>
    %12 = arith.addf %9, %11 : vector<16x32xf32>
    %cst_11 = arith.constant 0.000000e+00 : f32
    %13 = vector.broadcast %cst_11 : f32 to vector<16x32xf32>
    %14 = arith.maximumf %12, %13 : vector<16x32xf32>
    %c0_12 = arith.constant 0 : index
    %c0_13 = arith.constant 0 : index
    %15 = vector.load %arg6[%c0_12, %c0_13] : memref<32x1xf32, #tpu.memory_space<vmem>>, vector<32x1xf32>
    %cst_14 = arith.constant dense<0.000000e+00> : vector<16x1xf32>
    %16 = tpu.matmul %14, %15, %cst_14 {dimension_numbers = #tpu.dot_dimension_numbers<[1], [0], [0], [1], [0, 0, 1, 1], [], []>} : vector<16x32xf32>, vector<32x1xf32>, vector<16x1xf32> -> vector<16x1xf32>
    %c0_15 = arith.constant 0 : index
    %c0_16 = arith.constant 0 : index
    %17 = vector.load %arg7[%c0_15, %c0_16] : memref<1x1xf32, #tpu.memory_space<vmem>>, vector<1x1xf32>
    %18 = vector.broadcast %17 : vector<1x1xf32> to vector<16x1xf32>
    %19 = arith.addf %16, %18 : vector<16x1xf32>
    %20 = arith.negf %19 : vector<16x1xf32>
    %21 = math.exp %20 : vector<16x1xf32>
    %cst_17 = arith.constant 1.000000e+00 : f32
    %22 = vector.broadcast %cst_17 : f32 to vector<16x1xf32>
    %23 = arith.addf %22, %21 : vector<16x1xf32>
    %24 = arith.divf %22, %23 : vector<16x1xf32>
    %c0_18 = arith.constant 0 : index
    %c0_19 = arith.constant 0 : index
    %25 = vector.load %arg8[%c0_18, %c0_19] : memref<16x1xf32, #tpu.memory_space<vmem>>, vector<16x1xf32>
    tpu.vector_store %arg8[%c0_18, %c0_19], %24 {strides = array<i32>} : memref<16x1xf32, #tpu.memory_space<vmem>>, vector<16x1xf32>,
    return
  }
  func.func @transform_0(%arg0: i32) -> (i32, i32) {
    %c0_i32 = arith.constant 0 : i32
    %c0_i32_0 = arith.constant 0 : i32
    return %arg0, %c0_i32 : i32, i32
  }
  func.func @transform_1(%arg0: i32) -> (i32, i32) {
    %c0_i32 = arith.constant 0 : i32
    %c0_i32_0 = arith.constant 0 : i32
    %c0_i32_1 = arith.constant 0 : i32
    return %c0_i32, %c0_i32_0 : i32, i32
  }
  func.func @transform_2(%arg0: i32) -> (i32, i32) {
    %c0_i32 = arith.constant 0 : i32
    %c0_i32_0 = arith.constant 0 : i32
    %c0_i32_1 = arith.constant 0 : i32
    return %c0_i32, %c0_i32_0 : i32, i32
  }
  func.func @transform_3(%arg0: i32) -> (i32, i32) {
    %c0_i32 = arith.constant 0 : i32
    %c0_i32_0 = arith.constant 0 : i32
    %c0_i32_1 = arith.constant 0 : i32
    return %c0_i32, %c0_i32_0 : i32, i32
  }
  func.func @transform_4(%arg0: i32) -> (i32, i32) {
    %c0_i32 = arith.constant 0 : i32
    %c0_i32_0 = arith.constant 0 : i32
    %c0_i32_1 = arith.constant 0 : i32
    return %c0_i32, %c0_i32_0 : i32, i32
  }
  func.func @transform_5(%arg0: i32) -> (i32, i32) {
    %c0_i32 = arith.constant 0 : i32
    %c0_i32_0 = arith.constant 0 : i32
    %c0_i32_1 = arith.constant 0 : i32
    return %c0_i32, %c0_i32_0 : i32, i32
  }
  func.func @transform_6(%arg0: i32) -> (i32, i32) {
    %c0_i32 = arith.constant 0 : i32
    %c0_i32_0 = arith.constant 0 : i32
    %c0_i32_1 = arith.constant 0 : i32
    return %c0_i32, %c0_i32_0 : i32, i32
  }
  func.func @transform_7(%arg0: i32) -> (i32, i32) {
    %c0_i32 = arith.constant 0 : i32
    %c0_i32_0 = arith.constant 0 : i32
    return %arg0, %c0_i32 : i32, i32
  }
}

</mosaic_0001>

<bundles_post_ra>
// kernel: mlp32_forward.1
= control target key start
LH: loop header
LB: loop body
LE: loop exit
PB: predicated region body
PF: predicated region fallthrough
CT: control target
= control target key end

     0   :  { %vm45_vm0 = vcmask 523264   ;;  %vm140_vm1 = vcmask 261120   ;;  %vm328_vm2 = vcmask 7168   ;;  %s532_s1 = inlined_call_operand.vmem [shape: f32[64,32], index: 1, kind: input, shape index: {}]   ;;  %s533_s0 = inlined_call_operand.vmem [shape: f32[16,64], index: 0, kind: input, shape index: {}]   ;;  %s534_s3 = inlined_call_operand.vmem [shape: f32[32,32], index: 3, kind: input, shape index: {}]   ;;  %s535_s2 = inlined_call_operand.vmem [shape: f32[1,32], index: 2, kind: input, shape index: {}]   ;;  %s536_s5 = inlined_call_operand.vmem [shape: f32[32,1], index: 5, kind: input, shape index: {}]   ;;  %s537_s6 = inlined_call_operand.<no memory space> [shape: f32[1,1], index: 6, kind: input, shape index: {}]   ;;  %s538_s4 = inlined_call_operand.vmem [shape: f32[1,32], index: 4, kind: input, shape index: {}]   ;;  %s539_s7 = inlined_call_operand.vmem [shape: f32[16,1], index: 7, kind: output, shape index: {}]  }
   0x1   :  { %v37_v0 = vld [vmem:[%s532_s1 + $0x38] sm:$0xff]  ;;  %v36_v1 = vld [vmem:[%s532_s1 + $0x30] sm:$0xff]  ;;  %v35_v2 = vld [vmem:[%s532_s1 + $0x28] sm:$0xff]  ;;  %v12_v25 = vstv %s537_s6 }
   0x2   :  { %368 = vmatprep.subr.mxu0 %v37_v0  ;;  %v28_v3 = vld [vmem:[%s533_s0] sm:$0xff]  ;;  %v33_v5 = vld [vmem:[%s532_s1 + $0x18] sm:$0xff]  ;;  %v32_v6 = vld [vmem:[%s532_s1 + $0x10] sm:$0xff]  ;;  %13 = vst [vmem:[#allocation2] sm:$0x1] %v12_v25 }
   0x3   :  { %369 = vmatpush3.msra.mxu0 %v37_v0  ;;  %384 = vmatprep.mubr.msk.f32.mxu0 %vm45_vm0, %v28_v3  ;;  %v34_v4 = vld [vmem:[%s532_s1 + $0x20] sm:$0xff]  ;;  %v31_v7 = vld [vmem:[%s532_s1 + $0x8] sm:$0xff]  ;;  %v132_v10 = vld [vmem:[%s534_s3 + $0x18] sm:$0xff] }
   0x4   :  { %370 = vmatprep.subr.mxu0 %v36_v1  ;;  %v30_v8 = vld [vmem:[%s532_s1] sm:$0xff]  ;;  %v29_v9 = vld [vmem:[%s533_s0 + $0x8] sm:$0xff]  ;;  %387 = vmatprep.subr.mxu1 %v132_v10  ;;  %v131_v11 = vld [vmem:[%s534_s3 + $0x10] sm:$0xff] }
   0x5   :  { %371 = vmatpush3.msra.mxu0 %v36_v1  ;;  %388 = vmatpush3.msra.mxu1 %v132_v10  ;;  %v130_v12 = vld [vmem:[%s534_s3 + $0x8] sm:$0xff]  ;;  %v129_v13 = vld [vmem:[%s534_s3] sm:$0xff]  ;;  %v227_v21 = vld [vmem:[%s536_s5 + $0x18] sm:$0xff] }
   0x6   :  { %372 = vmatprep.subr.mxu0 %v35_v2  ;;  %389 = vmatprep.subr.mxu1 %v131_v11  ;;  %v335_v14 = vld [vmem:[%s535_s2] ss:$0 sm:$0xff]  ;;  %v226_v22 = vld [vmem:[%s536_s5 + $0x10] sm:$0xff]  ;;  %v225_v23 = vld [vmem:[%s536_s5 + $0x8] sm:$0xff] }
   0x7   :  { %373 = vmatpush3.msra.mxu0 %v35_v2  ;;  %390 = vmatpush3.msra.mxu1 %v131_v11  ;;  %v224_v24 = vld [vmem:[%s536_s5] sm:$0xff] }
   0x8   :  { %374 = vmatprep.subr.mxu0 %v34_v4  ;;  %391 = vmatprep.subr.mxu1 %v130_v12  ;;  %v338_v26 = vld [vmem:[%s538_s4] ss:$0 sm:$0xff] }
   0x9   :  { %375 = vmatpush3.msra.mxu0 %v34_v4  ;;  %392 = vmatpush3.msra.mxu1 %v130_v12  ;;  %v341_v33 = vld [vmem:[#allocation2] ss:$0 sm:$0xff] }
   0xa   :  { %376 = vmatprep.subr.mxu0 %v33_v5  ;;  %393 = vmatprep.subr.mxu1 %v129_v13 }
   0xb   :  { %377 = vmatpush3.msra.mxu0 %v33_v5  ;;  %394 = vmatpush3.msra.mxu1 %v129_v13 }
   0xc   :  { %378 = vmatprep.subr.mxu0 %v32_v6  ;;  %398 = vmatprep.subr.mxu1 %v227_v21 }
   0xd   :  { %379 = vmatpush3.msra.mxu0 %v32_v6 }
   0xe   :  { %380 = vmatprep.subr.mxu0 %v31_v7 }
   0xf   :  { %381 = vmatpush3.msra.mxu0 %v31_v7 }
  0x10   :  { %382 = vmatprep.subr.mxu0 %v30_v8 }
  0x11   :  { %383 = vmatpush3.msra.mxu0 %v30_v8 }
  0x12   :  { %385 = vmatmul.mubr.msk.f32.vlgmr.msra.gmra.mxu0 %vm45_vm0, %v29_v9 }
  0xd2   :  { %v386_v15 = vpop.f32.mrf.mxu0 }
  0xd3   :  { %v124_v16 = vadd.f32 %v386_v15, %v335_v14 }
  0xd4   :  { %v118_v17 = vpop.f32.mrf.mxu0 }
  0xd5   :  { %v119_v18 = vadd.f32 %v335_v14, %v118_v17  ;;  %v128_v20 = vmax.f32 %v124_v16, 0.0 }
  0xd7   :  { %v127_v19 = vmax.f32 %v119_v18, 0.0 }
  0xd9   :  { %395 = vmatprep.mubr.msk.f32.mxu1 %vm140_vm1, %v127_v19 }
  0xda   :  { %396 = vmatmul.mubr.msk.f32.vlgmr.msra.gmra.mxu1 %vm140_vm1, %v128_v20 }
  0xdb   :  { %399 = vmatpush3.msra.mxu1 %v227_v21 }
  0xdc   :  { %400 = vmatprep.subr.mxu1 %v226_v22 }
  0xdd   :  { %401 = vmatpush3.msra.mxu1 %v226_v22 }
  0xde   :  { %402 = vmatprep.subr.mxu1 %v225_v23 }
  0xdf   :  { %403 = vmatpush3.msra.mxu1 %v225_v23 }
  0xe0   :  { %404 = vmatprep.subr.mxu1 %v224_v24 }
  0xe1   :  { %405 = vmatpush3.msra.mxu1 %v224_v24 }
 0x19a   :  { %v397_v27 = vpop.f32.mrf.mxu1 }
 0x19b   :  { %v219_v28 = vadd.f32 %v397_v27, %v338_v26 }
 0x19c   :  { %v213_v29 = vpop.f32.mrf.mxu1 }
 0x19d   :  { %v214_v30 = vadd.f32 %v338_v26, %v213_v29  ;;  %v223_v32 = vmax.f32 %v219_v28, 0.0 }
 0x19f   :  { %v222_v31 = vmax.f32 %v214_v30, 0.0 }
 0x1a1   :  { %406 = vmatprep.mubr.msk.f32.mxu1 %vm140_vm1, %v222_v31 }
 0x1a2   :  { %407 = vmatmul.mubr.msk.f32.vlgmr.msra.gmra.mxu1 %vm140_vm1, %v223_v32 }
 0x262   :  { %v408_v34 = vpop.f32.mrf.mxu1 }
 0x263   :  { %v313_v35 = vadd.f32 %v408_v34, %v341_v33 }
 0x264   :  { %v307_v36 = vpop.f32.mrf.mxu1 }
 0x265   :  { %v345_v37 = vmul.f32 -1.442695, %v313_v35  ;;  %v308_v38 = vadd.f32 %v341_v33, %v307_v36 }
 0x267   :  { %409 = vpow2.f32 %v345_v37  ;;  %v344_v39 = vmul.f32 -1.442695, %v308_v38 }
 0x269   :  { %411 = vpow2.f32 %v344_v39 }
 0x274   :  { %v410_v40 = vpop.eup %409 }
 0x275   :  { %v323_v41 = vadd.f32 1.0, %v410_v40 }
 0x276   :  { %v412_v42 = vpop.eup %411 }
 0x277   :  { %413 = vrcp.f32 %v323_v41  ;;  %v322_v43 = vadd.f32 1.0, %v412_v42 }
 0x279   :  { %415 = vrcp.f32 %v322_v43 }
 0x284   :  { %v414_v44 = vpop.eup %413 }
 0x285   :  { %330 = vst.msk [vmem:[%s539_s7 + $0x8] sm:$0xff] %vm328_vm2, %v414_v44 }
 0x286   :  { %v416_v45 = vpop.eup %415 }
 0x287   :  { %329 = vst.msk [vmem:[%s539_s7] sm:$0xff] %vm328_vm2, %v416_v45 }

</bundles_post_ra>
